<compile_context>
chip_gen: v7x
topology: tpu7x:2x2x1
jax: 0.10.0
libtpu: 0.0.40
codegen_flags: <defaults>
</compile_context>

<pallas_src>
import functools

import jax
import jax.numpy as jnp
from jax.experimental import pallas as pl
from jax.experimental.pallas import tpu as pltpu

NUM_CHANNELS = 3
EMBED_DIM = 64

# Lane-dense padded shapes.
_EMB_ROWS_PAD = 8      # sublane-aligned row count for the embedding table
_LANE_PAD = 128        # lane width for embed dim / output channels / bias


def _layer_controller_kernel(idx_ref, emb_ref, wt_ref, b_ref, out_ref, *, n):
    """Single-step kernel: gather + sum N embedding rows, one matvec, one bias add.

    idx_ref : SMEM (n,)                int32  -- scalar-prefetched indices
    emb_ref : VMEM (8, 128)            f32    -- embedding table, zero-padded
    wt_ref  : VMEM (128, 128)          f32    -- W^T, zero-padded (in=64 rows, out=3 cols used)
    b_ref   : VMEM (1, 128)            f32    -- bias, zero-padded
    out_ref : VMEM (1, 128)            f32    -- lane-dense output slab (first 3 lanes valid)
    """
    # Sum of gathered embedding rows (padded lanes are zero, so they stay zero).
    e_sum = jnp.zeros((1, _LANE_PAD), jnp.float32)
    for i in range(n):                       # n is static (and tiny); fully unrolled
        row = idx_ref[i]                     # dynamic scalar index from SMEM
        e_sum = e_sum + emb_ref[pl.ds(row, 1), :]

    # (1,128) @ (128,128) -> (1,128); padded rows/cols of W^T are zero, so the
    # contraction is exactly e_sum[:, :64] @ W^T.
    y = jnp.dot(e_sum, wt_ref[...], preferred_element_type=jnp.float32)

    # sum_i (e_i @ W^T + b) == (sum_i e_i) @ W^T + n * b   (bias added once)
    out_ref[...] = y + jnp.float32(n) * b_ref[...]


def layer_controller_forward(indices, emb_table, lin_w, lin_b):
    """indices: (N,) integer; returns (NUM_CHANNELS,) float32."""
    indices = indices.astype(jnp.int32)      # int64 scalars unsupported in SMEM path
    n = int(indices.shape[0])

    # Zero-pad parameters to lane-dense slabs (one-time wrapper cost).
    emb_pad = (
        jnp.zeros((_EMB_ROWS_PAD, _LANE_PAD), jnp.float32)
        .at[:NUM_CHANNELS, :EMBED_DIM]
        .set(emb_table.astype(jnp.float32))
    )
    wt_pad = (
        jnp.zeros((_LANE_PAD, _LANE_PAD), jnp.float32)
        .at[:EMBED_DIM, :NUM_CHANNELS]
        .set(lin_w.astype(jnp.float32).T)    # transpose hoisted out of the kernel
    )
    b_pad = (
        jnp.zeros((1, _LANE_PAD), jnp.float32)
        .at[0, :NUM_CHANNELS]
        .set(lin_b.astype(jnp.float32))
    )

    out = pl.pallas_call(
        functools.partial(_layer_controller_kernel, n=n),
        out_shape=jax.ShapeDtypeStruct((1, _LANE_PAD), jnp.float32),
        grid_spec=pltpu.PrefetchScalarGridSpec(
            num_scalar_prefetch=1,            # indices land in SMEM
            grid=(1,),                        # single step: all work in one invocation
            in_specs=[
                pl.BlockSpec((_EMB_ROWS_PAD, _LANE_PAD), lambda i, idx: (0, 0)),
                pl.BlockSpec((_LANE_PAD, _LANE_PAD), lambda i, idx: (0, 0)),
                pl.BlockSpec((1, _LANE_PAD), lambda i, idx: (0, 0)),
            ],
            out_specs=pl.BlockSpec((1, _LANE_PAD), lambda i, idx: (0, 0)),
        ),
    )(indices, emb_pad, wt_pad, b_pad)

    return out[0, :NUM_CHANNELS]


if __name__ == "__main__":
    key = jax.random.PRNGKey(0)
    k_emb, k_w, k_b = jax.random.split(key, 3)

    # Deterministic synthetic parameters (shapes from __init__):
    #   nn.Embedding(NUM_CHANNELS, 64)   -> (3, 64)
    #   nn.Linear(64, NUM_CHANNELS)      -> W (3, 64), b (3,)
    emb_table = jax.random.normal(k_emb, (NUM_CHANNELS, EMBED_DIM), dtype=jnp.float32)
    bound = 1.0 / jnp.sqrt(EMBED_DIM)
    lin_w = jax.random.uniform(k_w, (NUM_CHANNELS, EMBED_DIM), jnp.float32, -bound, bound)
    lin_b = jax.random.uniform(k_b, (NUM_CHANNELS,), jnp.float32, -bound, bound)

    # forward() uses torch.zeros(1).long() as the index input.
    indices = jnp.zeros((1,), dtype=jnp.int32)

    out = layer_controller_forward(indices, emb_table, lin_w, lin_b)
    out = jax.block_until_ready(out)

    # Pure-JAX reference for sanity.
    ref = (emb_table[indices] @ lin_w.T + lin_b).sum(0)
    assert out.shape == (NUM_CHANNELS,)
    assert jnp.allclose(out, ref, atol=1e-5, rtol=1e-5), (out, ref)

    print("KERNEL_OK")
</pallas_src>

<mosaic_0001>
module attributes {stable_mosaic.version = 11 : i64} {
  func.func @_layer_controller_kernel(%arg0: i32, %arg1: memref<1xi32, #tpu.memory_space<smem>>, %arg2: memref<8x128xf32, #tpu.memory_space<vmem>>, %arg3: memref<128x128xf32, #tpu.memory_space<vmem>>, %arg4: memref<1x128xf32, #tpu.memory_space<vmem>>, %arg5: memref<1x128xf32, #tpu.memory_space<vmem>>) attributes {dimension_semantics = [#tpu.dimension_semantics<arbitrary>], iteration_bounds = array<i64: 1>, scalar_prefetch = 1 : i64, scratch_operands = 0 : i64, tpu.core_type = #tpu.core_type<tc>, window_params = [{pipeline_mode = #tpu.pipeline_mode<synchronous>, transform_indices = @transform_0, window_bounds = array<i64: 8, 128>}, {pipeline_mode = #tpu.pipeline_mode<synchronous>, transform_indices = @transform_1, window_bounds = array<i64: 128, 128>}, {pipeline_mode = #tpu.pipeline_mode<synchronous>, transform_indices = @transform_2, window_bounds = array<i64: 1, 128>}, {pipeline_mode = #tpu.pipeline_mode<synchronous>, transform_indices = @transform_3, window_bounds = array<i64: 1, 128>}]} {
    %cst = arith.constant 0.000000e+00 : f32
    %0 = vector.broadcast %cst : f32 to vector<1x128xf32>
    %c0 = arith.constant 0 : index
    %1 = memref.load %arg1[%c0] : memref<1xi32, #tpu.memory_space<smem>>
    %2 = arith.index_cast %1 : i32 to index
    %c0_0 = arith.constant 0 : index
    %3 = vector.load %arg2[%2, %c0_0] : memref<8x128xf32, #tpu.memory_space<vmem>>, vector<1x128xf32>
    %4 = arith.addf %0, %3 : vector<1x128xf32>
    %c0_1 = arith.constant 0 : index
    %c0_2 = arith.constant 0 : index
    %5 = vector.load %arg3[%c0_1, %c0_2] : memref<128x128xf32, #tpu.memory_space<vmem>>, vector<128x128xf32>
    %cst_3 = arith.constant dense<0.000000e+00> : vector<1x128xf32>
    %6 = tpu.matmul %4, %5, %cst_3 {dimension_numbers = #tpu.dot_dimension_numbers<[1], [0], [0], [1], [0, 0, 1, 1], [], []>} : vector<1x128xf32>, vector<128x128xf32>, vector<1x128xf32> -> vector<1x128xf32>
    %c0_4 = arith.constant 0 : index
    %c0_5 = arith.constant 0 : index
    %7 = vector.load %arg4[%c0_4, %c0_5] : memref<1x128xf32, #tpu.memory_space<vmem>>, vector<1x128xf32>
    %cst_6 = arith.constant 1.000000e+00 : f32
    %8 = vector.broadcast %cst_6 : f32 to vector<1x128xf32>
    %9 = arith.mulf %8, %7 : vector<1x128xf32>
    %10 = arith.addf %6, %9 : vector<1x128xf32>
    %c0_7 = arith.constant 0 : index
    %c0_8 = arith.constant 0 : index
    %11 = vector.load %arg5[%c0_7, %c0_8] : memref<1x128xf32, #tpu.memory_space<vmem>>, vector<1x128xf32>
    tpu.vector_store %arg5[%c0_7, %c0_8], %10 {strides = array<i32>} : memref<1x128xf32, #tpu.memory_space<vmem>>, vector<1x128xf32>,
    return
  }
  func.func @transform_0(%arg0: i32, %arg1: memref<1xi32, #tpu.memory_space<smem>>) -> (i32, i32) {
    %c0_i32 = arith.constant 0 : i32
    %c0_i32_0 = arith.constant 0 : i32
    %c0_i32_1 = arith.constant 0 : i32
    return %c0_i32, %c0_i32_0 : i32, i32
  }
  func.func @transform_1(%arg0: i32, %arg1: memref<1xi32, #tpu.memory_space<smem>>) -> (i32, i32) {
    %c0_i32 = arith.constant 0 : i32
    %c0_i32_0 = arith.constant 0 : i32
    %c0_i32_1 = arith.constant 0 : i32
    return %c0_i32, %c0_i32_0 : i32, i32
  }
  func.func @transform_2(%arg0: i32, %arg1: memref<1xi32, #tpu.memory_space<smem>>) -> (i32, i32) {
    %c0_i32 = arith.constant 0 : i32
    %c0_i32_0 = arith.constant 0 : i32
    %c0_i32_1 = arith.constant 0 : i32
    return %c0_i32, %c0_i32_0 : i32, i32
  }
  func.func @transform_3(%arg0: i32, %arg1: memref<1xi32, #tpu.memory_space<smem>>) -> (i32, i32) {
    %c0_i32 = arith.constant 0 : i32
    %c0_i32_0 = arith.constant 0 : i32
    %c0_i32_1 = arith.constant 0 : i32
    return %c0_i32, %c0_i32_0 : i32, i32
  }
}

</mosaic_0001>

<bundles_post_ra>
// kernel: tpu_custom_call.1
= control target key start
LH: loop header
LB: loop body
LE: loop exit
PB: predicated region body
PF: predicated region fallthrough
CT: control target
= control target key end

     0   :  { %10 = vsyncpa [#allocation5], 0  ;;  %s390_s0 = inlined_call_operand.<no memory space> [shape: s32[1], index: 0, kind: input, shape index: {}]   ;;  %s391_s1 = inlined_call_operand.hbm [shape: f32[8,128], index: 1, kind: input, shape index: {}]   ;;  %s392_s2 = inlined_call_operand.hbm [shape: f32[128,128], index: 2, kind: input, shape index: {}]   ;;  %s393_s3 = inlined_call_operand.vmem [shape: f32[1,128], index: 3, kind: input, shape index: {}]   ;;  %s394_s4 = inlined_call_operand.hbm [shape: f32[1,128], index: 4, kind: output, shape index: {}]  }
   0x1   :  { %11 = vsyncpa [#allocation8], 0 }
   0x2   :  { %12 = vsyncpa [#allocation6], 0  ;;  %s308_s15 = smov [#allocation4]   ;;  %s309_s17 = smov [#allocation7]  }
   0x3   :  { %s19_s16 = sshll.u32 %s308_s15, 4  ;;  %s28_s18 = sshll.u32 %s309_s17, 4  ;;  %s20_s16 = int_to_ptr.vmem [resolvable:$true] %s19_s16  ;;  %s341_s18 = int_to_ptr.vmem [resolvable:$true] %s28_s18 }
   0x4   :  { %s236_s21 = scalar_lea.hbm %s391_s1, 128 }
   0x5   :  { %p237_p0 = scmp.ne.s32.totalorder %s391_s1, %s236_s21  ;;  %p240_p1 = scmp.lt.u32.totalorder %s236_s21, %s391_s1 }
   0x7   :  { %p242_p2 = pnand %p240_p1, %p237_p0 }
   0x9   :  { %245 = shalt.err (!%p242_p2)
}
   0xa   :  { %s246_s26 = scalar_lea.vmem %s20_s16, 128  ;;  %p251_p4 = scmp.lt.s32.totalorder %s20_s16, %s20_s16 }
   0xb   :  { %p247_p3 = scmp.ne.s32.totalorder %s20_s16, %s246_s26  ;;  %p252_p5 = scmp.lt.s32.totalorder %s246_s26, %s246_s26 }
   0xd   :  { %p253_p6 = por %p252_p5, %p251_p4 }
   0xf   :  { %p254_p7 = pnand %p253_p6, %p247_p3 }
  0x11   :  { %257 = shalt.err (!%p254_p7)
}
  0x12   :  { %22 = dma.hbm_to_vmem [thread:$0]  %s391_s1, 128, %s20_s16, [#allocation5]  }
  0x13   :  { %s258_s5 = scalar_lea.hbm %s392_s2, 2048 }
  0x14   :  { %p259_p8 = scmp.ne.s32.totalorder %s392_s2, %s258_s5  ;;  %p262_p9 = scmp.lt.u32.totalorder %s258_s5, %s392_s2 }
  0x16   :  { %p264_p10 = pnand %p262_p9, %p259_p8 }
  0x18   :  { %267 = shalt.err (!%p264_p10)
}
  0x19   :  { %s268_s10 = scalar_lea.vmem %s341_s18, 2048  ;;  %p273_p12 = scmp.lt.s32.totalorder %s341_s18, %s341_s18 }
  0x1a   :  { %p269_p11 = scmp.ne.s32.totalorder %s341_s18, %s268_s10  ;;  %p274_p13 = scmp.lt.s32.totalorder %s268_s10, %s268_s10 }
  0x1c   :  { %p275_p0 = por %p274_p13, %p273_p12 }
  0x1e   :  { %p276_p1 = pnand %p275_p0, %p269_p11 }
  0x20   :  { %279 = shalt.err (!%p276_p1)
}
  0x21   :  { %s310_s1 = smov 128   ;;  %s311_s11 = smov 8  }
  0x22   :  { %34 = dma.hbm_to_vmem [thread:$0]  %s392_s2, 2048, %s341_s18, [#allocation8], %s310_s1, %s310_s1, %s311_s11  }
  0x23   :  { %302 = dma.done.wait [#allocation5], 128  }
  0x24   :  { %303 = vsyncadd [#allocation5], 4294967168 }
  0x25   :  { %304 = dma.done.wait [#allocation8], 2048  }
  0x26   :  { %305 = vsyncadd [#allocation8], 4294965248  ;;  %v312_v0 = vmov 0.0|0.0   ;;  %vm313_vm0 = vmmov 0   ;;  %v314_v1 = vmov 0.0   ;;  %v47_v2 = vld [vmem:[#allocation7] sm:$0xff] }
  0x27   :  { %204 = vmatprep.subr.bf16.mxu0 %v312_v0  ;;  %201 = vmatprep.mubr.msk.f32.mxu0 %vm313_vm0, %v314_v1  ;;  %v48_v3 = vld [vmem:[#allocation7 + $0x8] sm:$0xff]  ;;  %v49_v4 = vld [vmem:[#allocation7 + $0x10] sm:$0xff]  ;;  %v50_v6 = vld [vmem:[#allocation7 + $0x18] sm:$0xff]  ;;  %s44_s15 = scalar_lea.vmem [#allocation4], %s390_s0  ;;  %s315_s18 = smov [#allocation9]  }
  0x28   :  { %v205_v5 = vpack.c.bf16 %v48_v3, %v47_v2  ;;  %v208_v7 = vpack.c.bf16 %v50_v6, %v49_v4  ;;  %v51_v8 = vld [vmem:[#allocation7 + $0x20] sm:$0xff]  ;;  %v52_v9 = vld [vmem:[#allocation7 + $0x28] sm:$0xff]  ;;  %v53_v11 = vld [vmem:[#allocation7 + $0x30] sm:$0xff]  ;;  %s141_s19 = sshll.u32 %s315_s18, 4  ;;  %s142_s19 = int_to_ptr.vmem [resolvable:$true] %s141_s19 }
  0x29   :  { %v211_v10 = vpack.c.bf16 %v52_v9, %v51_v8  ;;  %v54_v12 = vld [vmem:[#allocation7 + $0x38] sm:$0xff]  ;;  %v55_v14 = vld [vmem:[#allocation7 + $0x40] sm:$0xff]  ;;  %v56_v15 = vld [vmem:[#allocation7 + $0x48] sm:$0xff]  ;;  %s280_s20 = scalar_lea.vmem %s142_s19, 16  ;;  %s284_s21 = scalar_lea.vmem %s142_s19, 32 }
  0x2a   :  { %206 = vmatpush3.bf16.msra.mxu0 %v205_v5  ;;  %v214_v13 = vpack.c.bf16 %v54_v12, %v53_v11  ;;  %v217_v16 = vpack.c.bf16 %v56_v15, %v55_v14  ;;  %v57_v17 = vld [vmem:[#allocation7 + $0x50] sm:$0xff]  ;;  %v58_v18 = vld [vmem:[#allocation7 + $0x58] sm:$0xff]  ;;  %v59_v20 = vld [vmem:[#allocation7 + $0x60] sm:$0xff]  ;;  %p281_p2 = scmp.ne.s32.totalorder %s142_s19, %s280_s20  ;;  %p285_p3 = scmp.lt.s32.totalorder %s142_s19, %s142_s19 }
  0x2b   :  { %207 = vmatprep.subr.bf16.mxu0 %v312_v0  ;;  %v220_v19 = vpack.c.bf16 %v58_v18, %v57_v17  ;;  %v60_v21 = vld [vmem:[#allocation7 + $0x68] sm:$0xff]  ;;  %v61_v23 = vld [vmem:[#allocation7 + $0x70] sm:$0xff]  ;;  %v62_v24 = vld [vmem:[#allocation7 + $0x78] sm:$0xff]  ;;  %p286_p4 = scmp.lt.s32.totalorder %s284_s21, %s280_s20 }
  0x2c   :  { %v223_v22 = vpack.c.bf16 %v60_v21, %v59_v20  ;;  %v226_v25 = vpack.c.bf16 %v62_v24, %v61_v23  ;;  %v45_v26 = vld [vmem:[%s44_s15] sm:$0x1] }
  0x2d   :  { %v63_v27 = vld [vmem:[%s393_s3] sm:$0x1]  ;;  %p287_p5 = por %p286_p4, %p285_p3 }
  0x2e   :  { %209 = vmatpush3.bf16.msra.mxu0 %v208_v7 }
  0x2f   :  { %210 = vmatprep.subr.bf16.mxu0 %v312_v0  ;;  %p288_p6 = pnand %p287_p5, %p281_p2 }
  0x32   :  { %212 = vmatpush3.bf16.msra.mxu0 %v211_v10 }
  0x33   :  { %213 = vmatprep.subr.bf16.mxu0 %v312_v0 }
  0x36   :  { %215 = vmatpush3.bf16.msra.mxu0 %v214_v13 }
  0x37   :  { %216 = vmatprep.subr.bf16.mxu0 %v312_v0 }
  0x3a   :  { %218 = vmatpush3.bf16.msra.mxu0 %v217_v16 }
  0x3b   :  { %219 = vmatprep.subr.bf16.mxu0 %v312_v0 }
  0x3e   :  { %221 = vmatpush3.bf16.msra.mxu0 %v220_v19 }
  0x3f   :  { %222 = vmatprep.subr.bf16.mxu0 %v312_v0 }
  0x42   :  { %224 = vmatpush3.bf16.msra.mxu0 %v223_v22 }
  0x43   :  { %225 = vmatprep.subr.bf16.mxu0 %v312_v0 }
  0x46   :  { %227 = vmatpush3.bf16.msra.mxu0 %v226_v25 }
  0x49   :  { %202 = vmatmul.mubr.f32.vlgmr.msra.gmra.mrb[0].mxu0 %v45_v26 }
 0x11c   :  { %v130_v28 = vpop.f32.mrb[0].mxu0 }
 0x11d   :  { %v131_v29 = vadd.f32 %v130_v28, %v63_v27  ;;  %v203_v30 = vpop.f32.mrb[1].mxu0 }
 0x11f   :  { %134 = vst [vmem:[#allocation9] sm:$0x1] %v131_v29 }
 0x120   :  { %291 = shalt.err (!%p288_p6)
}
 0x121   :  { %s292_s23 = scalar_lea.hbm %s394_s4, 16 }
 0x122   :  { %p293_p7 = scmp.ne.s32.totalorder %s394_s4, %s292_s23  ;;  %p296_p8 = scmp.lt.u32.totalorder %s292_s23, %s394_s4 }
 0x124   :  { %p298_p9 = pnand %p296_p8, %p293_p7 }
 0x126   :  { %301 = shalt.err (!%p298_p9)
}
 0x127   :  { %144 = dma.vmem_to_hbm [thread:$0]  %s142_s19, 16, %s394_s4, [#allocation6]  }
 0x128   :  { %306 = dma.done.wait [#allocation6], 16  }
 0x129   :  { %307 = vsyncadd [#allocation6], 4294967280 }
 0x12a   :  { %148 = vsyncpa [#allocation5], 1 }
 0x12b   :  { %149 = vsyncpa [#allocation8], 1 }
 0x12c   :  { %150 = vsyncpa [#allocation6], 1 }

</bundles_post_ra>
